<compile_context>
chip_gen: v5e
topology: v5e:2x2
jax: 0.10.0
libtpu: 0.0.40
codegen_flags: <defaults>
</compile_context>

<pallas_src>
import functools

import numpy as np
import jax
import jax.numpy as jnp
from jax.experimental import pallas as pl
from jax.experimental.pallas import tpu as pltpu


NODES_PER_GRAPH = 268                 # hardcoded in the torch module
POOLED_NODES = NODES_PER_GRAPH // 2   # 134


# ---------------------------------------------------------------------------
# Pallas kernel: pairwise node max
# ---------------------------------------------------------------------------

def _pair_max_kernel(x_ref, o_ref):
    """x_ref: (TM, 2*F) rows = [node 2j feats | node 2j+1 feats]; o_ref: (TM, F)."""
    f = o_ref.shape[-1]
    v = x_ref[...]
    o_ref[...] = jnp.maximum(v[:, :f], v[:, f:])


def _row_tile(m_rows, row_bytes, cap=256, budget_bytes=2 * 1024 * 1024):
    """Sublane-aligned row tile keeping one in-flight buffer ~<= 2 MiB (v7x-safe)."""
    tm = max(8, min(cap, (budget_bytes // max(row_bytes, 1)) // 8 * 8))
    padded_m = ((m_rows + 7) // 8) * 8
    return min(tm, padded_m)


def pair_max_pool(x2, f_out):
    """x2: (M, 2*F); returns (M, F) = elementwise max of the two lane halves."""
    m, two_f = map(int, x2.shape)
    tm = _row_tile(m, two_f * x2.dtype.itemsize)
    # TODO(synk): for extremely wide per-node features (>~256K f32 per node) also
    # tile the lane/feature axis (needs a pair-split layout or strided sublane loads).
    return pl.pallas_call(
        _pair_max_kernel,
        grid=(pl.cdiv(m, tm),),
        in_specs=[pl.BlockSpec((tm, two_f), lambda i: (i, 0))],
        out_specs=pl.BlockSpec((tm, f_out), lambda i: (i, 0)),
        out_shape=jax.ShapeDtypeStruct((m, f_out), x2.dtype),
        compiler_params=pltpu.CompilerParams(
            dimension_semantics=("parallel",)),
    )(x2)


# ---------------------------------------------------------------------------
# Graclus_Node_Pooling forward
# ---------------------------------------------------------------------------

@functools.partial(jax.jit, static_argnames=("nodes_per_graph",))
def graclus_node_pooling_forward(x_t, edge_index_t1, edge_weight_t1, t_batch,
                                 nodes_per_graph=NODES_PER_GRAPH):
    n_total = int(x_t.shape[0])
    assert n_total % nodes_per_graph == 0, "x_t rows must be num_graphs * 268"
    num_graphs = n_total // nodes_per_graph
    feat_shape = x_t.shape[1:]
    f = int(np.prod(feat_shape))
    m = n_total // 2                       # num_graphs * 134 pooled nodes

    # Pairwise node max over the whole batch at once (Pallas hot path).
    # The reshape is free (adjacent node rows become the two lane halves) and
    # 268 is even, so pairs never straddle a graph boundary.
    x2 = x_t.reshape(m, 2 * f)
    x_pooled = pair_max_pool(x2, f).reshape((m,) + tuple(feat_shape))

    # Batch.from_data_list glue: every pooled graph reuses edge_index_t1 /
    # edge_weight_t1 with a +134*g node offset.  Pure index bookkeeping, kept
    # in jnp on purpose (too tiny to pay a Pallas dispatch).
    pooled_nodes = nodes_per_graph // 2
    offs = jnp.arange(num_graphs, dtype=edge_index_t1.dtype) * pooled_nodes
    edge_index_t = edge_index_t1[None, :, :] + offs[:, None, None]     # (G, 2, E)
    edge_index_t = jnp.transpose(edge_index_t, (1, 0, 2)).reshape(2, -1)
    edge_weight_t = jnp.tile(edge_weight_t1, num_graphs)

    t_batch_pooled = t_batch[::2]
    return x_pooled, edge_index_t, edge_weight_t, t_batch_pooled


# ---------------------------------------------------------------------------
# Example
# ---------------------------------------------------------------------------

if __name__ == "__main__":
    key = jax.random.PRNGKey(0)
    k_x, k_w = jax.random.split(key)

    num_graphs, f1, f2 = 2, 8, 16
    n_total = num_graphs * NODES_PER_GRAPH            # 536 nodes, 2 graphs
    x_t = jax.random.normal(k_x, (n_total, f1, f2), jnp.float32)

    # Connectivity of the POOLED (134-node) graph, shared by every graph in the
    # batch — exactly how the torch module uses edge_index_t1 / edge_weight_t1.
    src = np.arange(POOLED_NODES, dtype=np.int32)
    dst = (src + 1) % POOLED_NODES
    edge_index_t1 = jnp.asarray(np.stack([src, dst]))         # (2, 134) ring
    edge_weight_t1 = jax.random.uniform(k_w, (POOLED_NODES,), jnp.float32)

    t_batch = jnp.repeat(jnp.arange(num_graphs, dtype=jnp.int32), NODES_PER_GRAPH)

    outs = graclus_node_pooling_forward(
        x_t, edge_index_t1, edge_weight_t1, t_batch,
        nodes_per_graph=NODES_PER_GRAPH)
    x_pooled, edge_index_t, edge_weight_t, t_batch_pooled = jax.block_until_ready(outs)

    # Reference check: max over each adjacent node pair (pure jnp/XLA).
    ref = jnp.maximum(x_t[0::2], x_t[1::2])
    np.testing.assert_allclose(np.asarray(x_pooled), np.asarray(ref), rtol=0, atol=0)
    assert x_pooled.shape == (num_graphs * POOLED_NODES, f1, f2)
    assert edge_index_t.shape == (2, num_graphs * int(edge_index_t1.shape[1]))
    assert edge_weight_t.shape == (num_graphs * int(edge_weight_t1.shape[0]),)
    assert t_batch_pooled.shape == (num_graphs * POOLED_NODES,)

    print("KERNEL_OK")
</pallas_src>

<mosaic_0001>
module attributes {stable_mosaic.version = 11 : i64} {
  func.func @_pair_max_kernel(%arg0: i32, %arg1: memref<256x256xf32, #tpu.memory_space<vmem>>, %arg2: memref<256x128xf32, #tpu.memory_space<vmem>>) attributes {dimension_semantics = [#tpu.dimension_semantics<parallel>], iteration_bounds = array<i64: 2>, scalar_prefetch = 0 : i64, scratch_operands = 0 : i64, tpu.core_type = #tpu.core_type<tc>, window_params = [{transform_indices = @transform_0, window_bounds = array<i64: 256, 256>}, {transform_indices = @transform_1, window_bounds = array<i64: 256, 128>}]} {
    %c0 = arith.constant 0 : index
    %c0_0 = arith.constant 0 : index
    %0 = vector.load %arg1[%c0, %c0_0] : memref<256x256xf32, #tpu.memory_space<vmem>>, vector<256x256xf32>
    %1 = vector.extract_strided_slice %0 {offsets = [0, 0], sizes = [256, 128], strides = [1, 1]} : vector<256x256xf32> to vector<256x128xf32>
    %2 = vector.extract_strided_slice %0 {offsets = [0, 128], sizes = [256, 128], strides = [1, 1]} : vector<256x256xf32> to vector<256x128xf32>
    %3 = arith.maximumf %1, %2 : vector<256x128xf32>
    %c0_1 = arith.constant 0 : index
    %c0_2 = arith.constant 0 : index
    %4 = vector.load %arg2[%c0_1, %c0_2] : memref<256x128xf32, #tpu.memory_space<vmem>>, vector<256x128xf32>
    tpu.vector_store %arg2[%c0_1, %c0_2], %3 {strides = array<i32>} : memref<256x128xf32, #tpu.memory_space<vmem>>, vector<256x128xf32>,
    return
  }
  func.func @transform_0(%arg0: i32) -> (i32, i32) {
    %c0_i32 = arith.constant 0 : i32
    %c0_i32_0 = arith.constant 0 : i32
    return %arg0, %c0_i32 : i32, i32
  }
  func.func @transform_1(%arg0: i32) -> (i32, i32) {
    %c0_i32 = arith.constant 0 : i32
    %c0_i32_0 = arith.constant 0 : i32
    return %arg0, %c0_i32 : i32, i32
  }
}

</mosaic_0001>

<bundles_post_ra>
// kernel: tile.8
= control target key start
LH: loop header
LB: loop body
LE: loop exit
PB: predicated region body
PF: predicated region fallthrough
CT: control target
= control target key end

     0   :  { %s34_s0 = inlined_call_operand.vmem [shape: f32[134], index: 0, kind: input, shape index: {}]   ;;  %s35_s1 = inlined_call_operand.vmem [shape: f32[2,134], index: 1, kind: output, shape index: {}]  }
   0x1   :  { %v4_v0 = vld [vmem:[%s34_s0] ss:$0 sm:$0xff]  ;;  %v10_v1 = vld [vmem:[%s34_s0 + $0x1] ss:$0 sm:$0xff] }
   0x2   :  { %5 = vst [vmem:[%s35_s1] sm:$0x3] %v4_v0 }
   0x3   :  { %11 = vst [vmem:[%s35_s1 + $0x2] sm:$0x3] %v10_v1 }

// kernel: tile.9
= control target key start
LH: loop header
LB: loop body
LE: loop exit
PB: predicated region body
PF: predicated region fallthrough
CT: control target
= control target key end

     0   :  { %s107_s0 = inlined_call_operand.vmem [shape: f32[2,134], index: 0, kind: input, shape index: {}]   ;;  %s108_s1 = inlined_call_operand.hbm [shape: f32[268], index: 1, kind: output, shape index: {}]  }
   0x1   :  { %v57_v0 = vld [vmem:[%s107_s0 + $0x2] sm:$0x3]  ;;  %v9_v1 = vld [vmem:[%s107_s0] sm:$0x3] }
   0x2   :  { %8 = vst [vmem:[#allocation3 + $0x8] sm:$0x3] %v57_v0 }
   0x3   :  { %2 = vsyncpa [#allocation1], 0  ;;  %10 = vst [vmem:[#allocation3] sm:$0x3] %v9_v1  ;;  %vm22_vm0 = vcmask 998400   ;;  %s86_s0 = smov 6  }
   0x4   :  { %vm13_vm1 = vcmask 48128   ;;  %vm29_vm2 = vcmask 97328   ;;  %vm36_vm3 = vcmask 1047600   ;;  %s87_s10 = smov [#allocation0]   ;;  %s50_s1 = sshll.u32 %s108_s1, 4  ;;  %s51_s1 = int_to_ptr.hbm [resolvable:$true] %s50_s1 }
   0x5   :  { %s48_s11 = sshll.u32 %s87_s10, 4  ;;  %s49_s11 = int_to_ptr.vmem [resolvable:$true] %s48_s11 }
   0x9   :  { %v21_v2 = vld [vmem:[#allocation3 + $0x9] sm:$0x1]   ;;  %v12_v6 = vld [vmem:[#allocation3 + $0x8] sm:$0x1]  }
   0xa   :  { %v19_v3 = vld [vmem:[#allocation3 + $0x1] sm:$0x1]   ;;  %15 = vst.msk [vmem:[#allocation2 + $0x1] sm:$0x1] %vm13_vm1, %v12_v6   ;;  %v16_v7 = vld [vmem:[#allocation3] sm:$0x1]  }
   0xb   :  { %v23_v4 = vsel %vm22_vm0, %v21_v2, %v19_v3  ;;  %v33_v5 = vld [vmem:[#allocation3 + $0x1] sm:$0x1]   ;;  %17 = vst [vmem:[#allocation2] sm:$0x1] %v16_v7  }
   0xc   :  { %24 = vrot.lane.b32.xlu0 %v23_v4, %s86_s0 }
  0x14   :  { %34 = vrot.lane.b32.xlu0 %v33_v5, %s86_s0 }
  0x7e   :  { %v25_v8 = vpop.permute.xlu0 %24  }
  0x7f   :  { %28 = vst.msk [vmem:[#allocation2 + $0x2] sm:$0x1] %vm13_vm1, %v25_v8  }
  0x80   :  { %31 = vst.msk [vmem:[#allocation2 + $0x2] sm:$0x1] %vm29_vm2, %v25_v8  }
  0x86   :  { %v35_v9 = vpop.permute.xlu0 %34  }
  0x87   :  { %38 = vst.msk [vmem:[#allocation2 + $0x1] sm:$0x1] %vm36_vm3, %v35_v9  }
  0x8e   :  { %v41_v10 = vld [vmem:[#allocation2] sm:$0xf] }
  0x8f   :  { %44 = vst [vmem:[#allocation0] sm:$0xf] %v41_v10 }
  0x90   :  { %53 = dma.vmem_to_hbm [thread:$0]  %s49_s11, 64, %s51_s1, [#allocation1]  }
  0x91   :  { %84 = dma.done.wait [#allocation1], 64  }
  0x92   :  { %85 = vsyncadd [#allocation1], 4294967232 }
  0x93   :  { %56 = vsyncpa [#allocation1], 1 }

// kernel: graclus_node_pooling_forward.1
= control target key start
LH: loop header
LB: loop body
LE: loop exit
PB: predicated region body
PF: predicated region fallthrough
CT: control target
= control target key end

     0   :  { %s829_s6 = smov 0   ;;  %s831_s7 = smov 0   ;;  %s1105_s0 = inlined_call_operand.vmem [shape: f32[268,256], index: 0, kind: input, shape index: {}]   ;;  %s1106_s1 = inlined_call_operand.vmem [shape: f32[268,128], index: 1, kind: output, shape index: {}]  }
   0x1   :  { %s833_s8 = smov 0  }
   0x2 LB: > { %s840_s9 = sadd.s32 4294967295, %s785_s8   ;;  %s842_s10 = sadd.s32 1, %s785_s8   ;;  %s785_s8 = sphi %s833_s8, %s1115_s8   ;;  %s781_s7 = sphi %s831_s7, %s1114_s7   ;;  %s777_s6 = sphi %s829_s6, %s1113_s6  }
   0x3   : > { %s41_s11 = ssub.s32 %s785_s8, %s842_s10  ;;  %s44_s12 = sadd.s32 1, %s781_s7 }
   0x4   : > { %p42_p0 = scmp.eq.s32.totalorder %s41_s11, 0  ;;  %p54_p1 = scmp.ne.s32.totalorder %s781_s7, %s777_s6 }
   0x5   : > { %p55_p2 = scmp.eq.s32.totalorder %s840_s9, 1  ;;  %p617_p3 = scmp.ge.s32.totalorder %s785_s8, 1 }
   0x6   : > { %s849_s13 = scalar_select %p42_p0, %s781_s7, %s44_s12  }
   0x7   : > { %p851_p4 = por %p55_p2, %p54_p1  ;;  %p99_p5 = scmp.lt.s32.totalorder %s785_s8, 3 }
   0x9   : > { %p100_p6 = pnand %p617_p3, %p99_p5 }
   0xa   : > { %s856_s15 = sshll.u32 (!%p100_p6), %s840_s9, 5  ;;  %s121_s16 = sand.u32 (!%p100_p6), 1, %s777_s6  }
   0xb   : > { %103 = sbr.rel (%p100_p6) target bundleno = 119 (0x77), region = 24  ;;  %p130_p7 = scmp.lt.s32.totalorder (!%p100_p6), %s856_s15, 33 }
   0xc   : > { %s618_s18 = sshll.u32 (!%p100_p6), %s121_s16, 8 }
   0xd   : > { %s874_s23 = scalar_lea.vmem (!%p100_p6), [#allocation2], %s618_s18  }
  0x10   : > { %s131_s17 = scalar_select %p130_p7, %s856_s15, 33 }
  0x11   : > { %s282_s24 = ssub.s32 (%p851_p4), 34, %s856_s15  ;;  %s640_s25 = sshll.u32 (%p851_p4), %s840_s9, 8 }
  0x12   : > { %s639_s19 = sshll.u32 %s131_s17, 4  ;;  %p283_p8 = scmp.lt.s32.totalorder (%p851_p4), %s282_s24, 32 }
  0x13   : > { %s863_s22 = scalar_lea.vmem %s1105_s0, %s639_s19  ;;  %s970_s28 = scalar_lea.vmem (%p851_p4), %s1106_s1, %s640_s25  }
  0x14   : > { %v146_v0 = vld [vmem:[%s863_s22] sm:$0xff]  ;;  %v147_v1 = vld [vmem:[%s863_s22 + $0x8] sm:$0xff]  ;;  %v148_v2 = vld [vmem:[%s863_s22 + $0x10] sm:$0xff] }
  0x15   : > { %v210_v3 = vmax.f32 %v146_v0, %v147_v1  ;;  %v149_v4 = vld [vmem:[%s863_s22 + $0x18] sm:$0xff]  ;;  %v150_v5 = vld [vmem:[%s863_s22 + $0x20] sm:$0xff]  ;;  %v151_v6 = vld [vmem:[%s863_s22 + $0x28] sm:$0xff] }
  0x16   : > { %v211_v7 = vmax.f32 %v148_v2, %v149_v4  ;;  %v212_v8 = vmax.f32 %v150_v5, %v151_v6  ;;  %v152_v9 = vld [vmem:[%s863_s22 + $0x30] sm:$0xff]  ;;  %v153_v10 = vld [vmem:[%s863_s22 + $0x38] sm:$0xff]  ;;  %v154_v11 = vld [vmem:[%s863_s22 + $0x40] sm:$0xff] }
  0x17   : > { %242 = vst [vmem:[%s874_s23] sm:$0xff] %v210_v3  ;;  %v213_v12 = vmax.f32 %v152_v9, %v153_v10  ;;  %v155_v13 = vld [vmem:[%s863_s22 + $0x48] sm:$0xff]  ;;  %v156_v14 = vld [vmem:[%s863_s22 + $0x50] sm:$0xff]  ;;  %v157_v15 = vld [vmem:[%s863_s22 + $0x58] sm:$0xff] }
  0x18   : > { %243 = vst [vmem:[%s874_s23 + $0x8] sm:$0xff] %v211_v7  ;;  %v214_v16 = vmax.f32 %v154_v11, %v155_v13  ;;  %v215_v17 = vmax.f32 %v156_v14, %v157_v15  ;;  %v158_v18 = vld [vmem:[%s863_s22 + $0x60] sm:$0xff]  ;;  %v159_v19 = vld [vmem:[%s863_s22 + $0x68] sm:$0xff]  ;;  %v160_v20 = vld [vmem:[%s863_s22 + $0x70] sm:$0xff] }
  0x19   : > { %244 = vst [vmem:[%s874_s23 + $0x10] sm:$0xff] %v212_v8  ;;  %v216_v21 = vmax.f32 %v158_v18, %v159_v19  ;;  %v161_v22 = vld [vmem:[%s863_s22 + $0x78] sm:$0xff]  ;;  %v162_v23 = vld [vmem:[%s863_s22 + $0x80] sm:$0xff]  ;;  %v163_v24 = vld [vmem:[%s863_s22 + $0x88] sm:$0xff] }
  0x1a   : > { %245 = vst [vmem:[%s874_s23 + $0x18] sm:$0xff] %v213_v12  ;;  %v217_v25 = vmax.f32 %v160_v20, %v161_v22  ;;  %v164_v26 = vld [vmem:[%s863_s22 + $0x90] sm:$0xff]  ;;  %v165_v27 = vld [vmem:[%s863_s22 + $0x98] sm:$0xff]  ;;  %v166_v28 = vld [vmem:[%s863_s22 + $0xa0] sm:$0xff]  ;;  %v218_v29 = vmax.f32 %v162_v23, %v163_v24 }
  0x1b   : > { %246 = vst [vmem:[%s874_s23 + $0x20] sm:$0xff] %v214_v16  ;;  %v167_v30 = vld [vmem:[%s863_s22 + $0xa8] sm:$0xff]  ;;  %v168_v31 = vld [vmem:[%s863_s22 + $0xb0] sm:$0xff]  ;;  %v169_v32 = vld [vmem:[%s863_s22 + $0xb8] sm:$0xff]  ;;  %v219_v33 = vmax.f32 %v164_v26, %v165_v27 }
  0x1c   : > { %247 = vst [vmem:[%s874_s23 + $0x28] sm:$0xff] %v215_v17  ;;  %v170_v34 = vld [vmem:[%s863_s22 + $0xc0] sm:$0xff]  ;;  %v171_v35 = vld [vmem:[%s863_s22 + $0xc8] sm:$0xff]  ;;  %v220_v36 = vmax.f32 %v166_v28, %v167_v30  ;;  %v172_v37 = vld [vmem:[%s863_s22 + $0xd0] sm:$0xff]  ;;  %v221_v39 = vmax.f32 %v168_v31, %v169_v32 }
  0x1d   : > { %248 = vst [vmem:[%s874_s23 + $0x30] sm:$0xff] %v216_v21  ;;  %v173_v38 = vld [vmem:[%s863_s22 + $0xd8] sm:$0xff]  ;;  %v174_v40 = vld [vmem:[%s863_s22 + $0xe0] sm:$0xff]  ;;  %v175_v41 = vld [vmem:[%s863_s22 + $0xe8] sm:$0xff]  ;;  %v222_v42 = vmax.f32 %v170_v34, %v171_v35 }
  0x1e   : > { %249 = vst [vmem:[%s874_s23 + $0x38] sm:$0xff] %v217_v25  ;;  %v176_v43 = vld [vmem:[%s863_s22 + $0xf0] sm:$0xff]  ;;  %v177_v44 = vld [vmem:[%s863_s22 + $0xf8] sm:$0xff]  ;;  %v223_v45 = vmax.f32 %v172_v37, %v173_v38  ;;  %v178_v46 = vld [vmem:[%s863_s22 + $0x100] sm:$0xff]  ;;  %v224_v48 = vmax.f32 %v174_v40, %v175_v41 }
  0x1f   : > { %250 = vst [vmem:[%s874_s23 + $0x40] sm:$0xff] %v218_v29  ;;  %v179_v47 = vld [vmem:[%s863_s22 + $0x108] sm:$0xff]  ;;  %v180_v49 = vld [vmem:[%s863_s22 + $0x110] sm:$0xff]  ;;  %v181_v50 = vld [vmem:[%s863_s22 + $0x118] sm:$0xff]  ;;  %v225_v51 = vmax.f32 %v176_v43, %v177_v44 }
  0x20   : > { %251 = vst [vmem:[%s874_s23 + $0x48] sm:$0xff] %v219_v33  ;;  %v182_v52 = vld [vmem:[%s863_s22 + $0x120] sm:$0xff]  ;;  %v183_v53 = vld [vmem:[%s863_s22 + $0x128] sm:$0xff]  ;;  %v226_v54 = vmax.f32 %v178_v46, %v179_v47  ;;  %v184_v55 = vld [vmem:[%s863_s22 + $0x130] sm:$0xff]  ;;  %v227_v57 = vmax.f32 %v180_v49, %v181_v50 }
  0x21   : > { %252 = vst [vmem:[%s874_s23 + $0x50] sm:$0xff] %v220_v36  ;;  %v185_v56 = vld [vmem:[%s863_s22 + $0x138] sm:$0xff]  ;;  %v186_v58 = vld [vmem:[%s863_s22 + $0x140] sm:$0xff]  ;;  %v187_v59 = vld [vmem:[%s863_s22 + $0x148] sm:$0xff]  ;;  %v228_v60 = vmax.f32 %v182_v52, %v183_v53 }
  0x22   : > { %253 = vst [vmem:[%s874_s23 + $0x58] sm:$0xff] %v221_v39  ;;  %v188_v61 = vld [vmem:[%s863_s22 + $0x150] sm:$0xff]  ;;  %v189_v62 = vld [vmem:[%s863_s22 + $0x158] sm:$0xff]  ;;  %v229_v63 = vmax.f32 %v184_v55, %v185_v56  ;;  %v190_v0 = vld [vmem:[%s863_s22 + $0x160] sm:$0xff]  ;;  %v230_v2 = vmax.f32 %v186_v58, %v187_v59 }
  0x23   : > { %254 = vst [vmem:[%s874_s23 + $0x60] sm:$0xff] %v222_v42  ;;  %v191_v1 = vld [vmem:[%s863_s22 + $0x168] sm:$0xff]  ;;  %v192_v3 = vld [vmem:[%s863_s22 + $0x170] sm:$0xff]  ;;  %v193_v4 = vld [vmem:[%s863_s22 + $0x178] sm:$0xff]  ;;  %v231_v5 = vmax.f32 %v188_v61, %v189_v62 }
  0x24   : > { %255 = vst [vmem:[%s874_s23 + $0x68] sm:$0xff] %v223_v45  ;;  %v194_v6 = vld [vmem:[%s863_s22 + $0x180] sm:$0xff]  ;;  %v195_v7 = vld [vmem:[%s863_s22 + $0x188] sm:$0xff]  ;;  %v232_v8 = vmax.f32 %v190_v0, %v191_v1  ;;  %v196_v9 = vld [vmem:[%s863_s22 + $0x190] sm:$0xff]  ;;  %v233_v11 = vmax.f32 %v192_v3, %v193_v4 }
  0x25   : > { %256 = vst [vmem:[%s874_s23 + $0x70] sm:$0xff] %v224_v48  ;;  %v197_v10 = vld [vmem:[%s863_s22 + $0x198] sm:$0xff]  ;;  %v198_v12 = vld [vmem:[%s863_s22 + $0x1a0] sm:$0xff]  ;;  %v199_v13 = vld [vmem:[%s863_s22 + $0x1a8] sm:$0xff]  ;;  %v234_v14 = vmax.f32 %v194_v6, %v195_v7 }
  0x26   : > { %257 = vst [vmem:[%s874_s23 + $0x78] sm:$0xff] %v225_v51  ;;  %v200_v15 = vld [vmem:[%s863_s22 + $0x1b0] sm:$0xff]  ;;  %v201_v16 = vld [vmem:[%s863_s22 + $0x1b8] sm:$0xff]  ;;  %v235_v17 = vmax.f32 %v196_v9, %v197_v10  ;;  %v202_v18 = vld [vmem:[%s863_s22 + $0x1c0] sm:$0xff]  ;;  %v236_v20 = vmax.f32 %v198_v12, %v199_v13 }
  0x27   : > { %258 = vst [vmem:[%s874_s23 + $0x80] sm:$0xff] %v226_v54  ;;  %v203_v19 = vld [vmem:[%s863_s22 + $0x1c8] sm:$0xff]  ;;  %v204_v21 = vld [vmem:[%s863_s22 + $0x1d0] sm:$0xff]  ;;  %v205_v22 = vld [vmem:[%s863_s22 + $0x1d8] sm:$0xff]  ;;  %v237_v23 = vmax.f32 %v200_v15, %v201_v16 }
  0x28   : > { %259 = vst [vmem:[%s874_s23 + $0x88] sm:$0xff] %v227_v57  ;;  %v206_v24 = vld [vmem:[%s863_s22 + $0x1e0] sm:$0xff]  ;;  %v207_v25 = vld [vmem:[%s863_s22 + $0x1e8] sm:$0xff]  ;;  %v238_v26 = vmax.f32 %v202_v18, %v203_v19  ;;  %v208_v27 = vld [vmem:[%s863_s22 + $0x1f0] sm:$0xff]  ;;  %v239_v29 = vmax.f32 %v204_v21, %v205_v22 }
  0x29   : > { %260 = vst [vmem:[%s874_s23 + $0x90] sm:$0xff] %v228_v60  ;;  %v209_v28 = vld [vmem:[%s863_s22 + $0x1f8] sm:$0xff]  ;;  %v240_v30 = vmax.f32 %v206_v24, %v207_v25 }
  0x2a   : > { %261 = vst [vmem:[%s874_s23 + $0x98] sm:$0xff] %v229_v63  ;;  %v241_v31 = vmax.f32 %v208_v27, %v209_v28 }
  0x2b   : > { %262 = vst [vmem:[%s874_s23 + $0xa0] sm:$0xff] %v230_v2 }
  0x2c   : > { %263 = vst [vmem:[%s874_s23 + $0xa8] sm:$0xff] %v231_v5 }
  0x2d   : > { %264 = vst [vmem:[%s874_s23 + $0xb0] sm:$0xff] %v232_v8 }
  0x2e   : > { %265 = vst [vmem:[%s874_s23 + $0xb8] sm:$0xff] %v233_v11 }
  0x2f   : > { %266 = vst [vmem:[%s874_s23 + $0xc0] sm:$0xff] %v234_v14 }
  0x30   : > { %267 = vst [vmem:[%s874_s23 + $0xc8] sm:$0xff] %v235_v17 }
  0x31   : > { %268 = vst [vmem:[%s874_s23 + $0xd0] sm:$0xff] %v236_v20 }
  0x32   : > { %269 = vst [vmem:[%s874_s23 + $0xd8] sm:$0xff] %v237_v23  ;;  %280 = sbr.rel (!%p851_p4) target bundleno = 119 (0x77), region = 28 }
  0x33   : > { %270 = vst [vmem:[%s874_s23 + $0xe0] sm:$0xff] %v238_v26 }
  0x34   : > { %271 = vst [vmem:[%s874_s23 + $0xe8] sm:$0xff] %v239_v29 }
  0x35   : > { %272 = vst [vmem:[%s874_s23 + $0xf0] sm:$0xff] %v240_v30 }
  0x36   : > { %273 = vst [vmem:[%s874_s23 + $0xf8] sm:$0xff] %v241_v31 }
  0x37   : > { %s1117_s24 = smov (!%p283_p8, %s282_s24), 32 }
  0x38   : > { %s624_s29 = sshll.u32 %s1117_s24, 3 }
  0x39   : > { %p627_p9 = scmp.eq.s32.totalorder %s624_s29, 0 }
  0x3a   : > { %s976_s30 = sshrl.u32 (!%p627_p9), %s1117_s24, 5 }
  0x3b   : > { %291 = sbr.rel (%p627_p9) target bundleno = 119 (0x77), region = 32  ;;  %p628_p10 = scmp.le.s32.totalorder (!%p627_p9), %s976_s30, 0 }
  0x40   : > { %570 = sbr.rel (%p628_p10) target bundleno = 102 (0x66), region = 108  ;;  %s1108_s2 = smov (!%p628_p10), %s970_s28 }
  0x41   : > { %s1109_s3 = smov (!%p628_p10), %s874_s23  ;;  %s985_s4 = smov (!%p628_p10), 0  }
  0x42   : > { %s987_s5 = smov (!%p628_p10), 0  }
  0x45 LB: >> { %v416_v32 = vld [vmem:[%s793_s3] sm:$0xff]  ;;  %v418_v33 = vld [vmem:[%s793_s3 + $0x8] sm:$0xff]  ;;  %v420_v34 = vld [vmem:[%s793_s3 + $0x10] sm:$0xff]  ;;  %s480_s6 = sadd.s32 1, %s797_s4  ;;  %s410_s5 = sadd.s32 1, %s801_s5   ;;  %s801_s5 = sphi %s987_s5, %s410_s5   ;;  %s797_s4 = sphi %s985_s4, %s1112_s4   ;;  %s793_s3 = sphi %s1109_s3, %s1111_s3   ;;  %s789_s2 = sphi %s1108_s2, %s1110_s2  }
  0x46   : >> { %417 = vst [vmem:[%s789_s2] sm:$0xff] %v416_v32  ;;  %v422_v35 = vld [vmem:[%s793_s3 + $0x18] sm:$0xff]  ;;  %p481_p11 = scmp.ge.s32.totalorder %s480_s6, %s976_s30  ;;  %v424_v36 = vld [vmem:[%s793_s3 + $0x20] sm:$0xff]  ;;  %v426_v37 = vld [vmem:[%s793_s3 + $0x28] sm:$0xff]  ;;  %p409_p12 = scmp.ge.s32.totalorder %s410_s5, %s976_s30 }
  0x47   : >> { %419 = vst [vmem:[%s789_s2 + $0x8] sm:$0xff] %v418_v33  ;;  %v428_v38 = vld [vmem:[%s793_s3 + $0x30] sm:$0xff]  ;;  %v430_v39 = vld [vmem:[%s793_s3 + $0x38] sm:$0xff]  ;;  %v432_v40 = vld [vmem:[%s793_s3 + $0x40] sm:$0xff] }
  0x48   : >> { %421 = vst [vmem:[%s789_s2 + $0x10] sm:$0xff] %v420_v34  ;;  %s1119_s6 = smov (%p481_p11, %s480_s6), 0  ;;  %v434_v41 = vld [vmem:[%s793_s3 + $0x48] sm:$0xff]  ;;  %v436_v42 = vld [vmem:[%s793_s3 + $0x50] sm:$0xff]  ;;  %v438_v43 = vld [vmem:[%s793_s3 + $0x58] sm:$0xff] }
  0x49   : >> { %423 = vst [vmem:[%s789_s2 + $0x18] sm:$0xff] %v422_v35  ;;  %s629_s8 = sshll.u32 %s1119_s6, 8  ;;  %v440_v44 = vld [vmem:[%s793_s3 + $0x60] sm:$0xff]  ;;  %v442_v45 = vld [vmem:[%s793_s3 + $0x68] sm:$0xff]  ;;  %v444_v46 = vld [vmem:[%s793_s3 + $0x70] sm:$0xff]  ;;  %s1112_s4 = smov %s1119_s6 }
  0x4a   : >> { %425 = vst [vmem:[%s789_s2 + $0x20] sm:$0xff] %v424_v36  ;;  %s1019_s9 = scalar_lea.vmem %s874_s23, %s629_s8 [#allocation2]   ;;  %s1022_s11 = scalar_lea.vmem %s970_s28, %s629_s8   ;;  %v446_v47 = vld [vmem:[%s793_s3 + $0x78] sm:$0xff]  ;;  %v448_v48 = vld [vmem:[%s793_s3 + $0x80] sm:$0xff]  ;;  %v450_v49 = vld [vmem:[%s793_s3 + $0x88] sm:$0xff] }
  0x4b   : >> { %427 = vst [vmem:[%s789_s2 + $0x28] sm:$0xff] %v426_v37  ;;  %v452_v50 = vld [vmem:[%s793_s3 + $0x90] sm:$0xff]  ;;  %v454_v51 = vld [vmem:[%s793_s3 + $0x98] sm:$0xff]  ;;  %v456_v52 = vld [vmem:[%s793_s3 + $0xa0] sm:$0xff] }
  0x4c   : >> { %429 = vst [vmem:[%s789_s2 + $0x30] sm:$0xff] %v428_v38  ;;  %v458_v53 = vld [vmem:[%s793_s3 + $0xa8] sm:$0xff]  ;;  %v460_v54 = vld [vmem:[%s793_s3 + $0xb0] sm:$0xff]  ;;  %v462_v55 = vld [vmem:[%s793_s3 + $0xb8] sm:$0xff] }
  0x4d   : >> { %431 = vst [vmem:[%s789_s2 + $0x38] sm:$0xff] %v430_v39  ;;  %v464_v56 = vld [vmem:[%s793_s3 + $0xc0] sm:$0xff]  ;;  %v466_v57 = vld [vmem:[%s793_s3 + $0xc8] sm:$0xff]  ;;  %v468_v58 = vld [vmem:[%s793_s3 + $0xd0] sm:$0xff] }
  0x4e   : >> { %433 = vst [vmem:[%s789_s2 + $0x40] sm:$0xff] %v432_v40  ;;  %v470_v59 = vld [vmem:[%s793_s3 + $0xd8] sm:$0xff]  ;;  %v472_v60 = vld [vmem:[%s793_s3 + $0xe0] sm:$0xff]  ;;  %v474_v61 = vld [vmem:[%s793_s3 + $0xe8] sm:$0xff] }
  0x4f   : >> { %435 = vst [vmem:[%s789_s2 + $0x48] sm:$0xff] %v434_v41  ;;  %v476_v62 = vld [vmem:[%s793_s3 + $0xf0] sm:$0xff]  ;;  %v478_v63 = vld [vmem:[%s793_s3 + $0xf8] sm:$0xff]  ;;  %s1111_s3 = smov %s1019_s9 }
  0x50   : >> { %437 = vst [vmem:[%s789_s2 + $0x50] sm:$0xff] %v436_v42 }
  0x51   : >> { %439 = vst [vmem:[%s789_s2 + $0x58] sm:$0xff] %v438_v43 }
  0x52   : >> { %441 = vst [vmem:[%s789_s2 + $0x60] sm:$0xff] %v440_v44 }
  0x53   : >> { %443 = vst [vmem:[%s789_s2 + $0x68] sm:$0xff] %v442_v45 }
  0x54   : >> { %445 = vst [vmem:[%s789_s2 + $0x70] sm:$0xff] %v444_v46 }
  0x55   : >> { %447 = vst [vmem:[%s789_s2 + $0x78] sm:$0xff] %v446_v47 }
  0x56   : >> { %449 = vst [vmem:[%s789_s2 + $0x80] sm:$0xff] %v448_v48 }
  0x57   : >> { %451 = vst [vmem:[%s789_s2 + $0x88] sm:$0xff] %v450_v49 }
  0x58   : >> { %453 = vst [vmem:[%s789_s2 + $0x90] sm:$0xff] %v452_v50 }
  0x59   : >> { %455 = vst [vmem:[%s789_s2 + $0x98] sm:$0xff] %v454_v51 }
  0x5a   : >> { %457 = vst [vmem:[%s789_s2 + $0xa0] sm:$0xff] %v456_v52 }
  0x5b   : >> { %459 = vst [vmem:[%s789_s2 + $0xa8] sm:$0xff] %v458_v53 }
  0x5c   : >> { %461 = vst [vmem:[%s789_s2 + $0xb0] sm:$0xff] %v460_v54 }
  0x5d   : >> { %463 = vst [vmem:[%s789_s2 + $0xb8] sm:$0xff] %v462_v55 }
  0x5e   : >> { %465 = vst [vmem:[%s789_s2 + $0xc0] sm:$0xff] %v464_v56 }
  0x5f   : >> { %467 = vst [vmem:[%s789_s2 + $0xc8] sm:$0xff] %v466_v57 }
  0x60   : >> { %469 = vst [vmem:[%s789_s2 + $0xd0] sm:$0xff] %v468_v58 }
  0x61   : >> { %471 = vst [vmem:[%s789_s2 + $0xd8] sm:$0xff] %v470_v59  ;;  %412 = sbr.rel (!%p409_p12) target bundleno = 69 (0x45), region = 114 }
  0x62   : >> { %473 = vst [vmem:[%s789_s2 + $0xe0] sm:$0xff] %v472_v60 }
  0x63   : >> { %475 = vst [vmem:[%s789_s2 + $0xe8] sm:$0xff] %v474_v61 }
  0x64   : >> { %477 = vst [vmem:[%s789_s2 + $0xf0] sm:$0xff] %v476_v62 }
  0x65   : >> { %479 = vst [vmem:[%s789_s2 + $0xf8] sm:$0xff] %v478_v63  ;;  %s1110_s2 = smov %s1022_s11 }
  0x66 PF: > { %s1087_s12 = sand.u32 31, %s1117_s24   ;;  %s641_s14 = sshll.u32 %s976_s30, 8 }
  0x67   : > { %s491_s15 = scalar_lea.vmem %s874_s23, %s641_s14 [#allocation2]   ;;  %s493_s16 = scalar_lea.vmem %s970_s28, %s641_s14  }
  0x68   : > { %p634_p13 = scmp.le.s32.totalorder %s1087_s12, 0 }
  0x69   : > { %s803_s17 = smov (!%p634_p13), %s493_s16   ;;  %s807_s18 = smov (!%p634_p13), %s491_s15  }
  0x6a   : > { %584 = sbr.rel (%p634_p13) target bundleno = 119 (0x77), region = 119  ;;  %s811_s19 = smov (!%p634_p13), 0  }
  0x6b   : > { %s815_s20 = smov (!%p634_p13), 0  }
  0x6f LB: >> { %v503_v0 = vld [vmem:[%s809_s18] sm:$0xff]  ;;  %s505_s21 = sadd.s32 1, %s813_s19  ;;  %s497_s20 = sadd.s32 1, %s817_s20   ;;  %s817_s20 = sphi %s815_s20, %s497_s20   ;;  %s813_s19 = sphi %s811_s19, %s812_s19   ;;  %s809_s18 = sphi %s807_s18, %s510_s18   ;;  %s805_s17 = sphi %s803_s17, %s511_s17  }
  0x70   : >> { %504 = vst [vmem:[%s805_s17] sm:$0xff] %v503_v0  ;;  %p506_p0 = scmp.ge.s32.totalorder %s505_s21, %s1087_s12  ;;  %p496_p1 = scmp.ge.s32.totalorder %s497_s20, %s1087_s12 }
  0x72   : >> { %s1121_s21 = smov (%p506_p0, %s505_s21), 0  ;;  %499 = sbr.rel (!%p496_p1) target bundleno = 111 (0x6f), region = 125 }
  0x73   : >> { %s635_s22 = sshll.u32 %s1121_s21, 3  ;;  %s812_s19 = smov %s1121_s21  }
  0x74   : >> { %s510_s18 = scalar_lea.vmem %s491_s15, %s635_s22 [#allocation2]   ;;  %s511_s17 = scalar_lea.vmem %s493_s16, %s635_s22  }
  0x77 PF: > { %p8_p2 = scmp.ge.s32.totalorder %s842_s10, 4   ;;  %s1113_s6 = smov %s781_s7 }
  0x78   : > { %s1114_s7 = smov %s849_s13  ;;  %s1115_s8 = smov %s842_s10 }
  0x79   :  { %10 = sbr.rel (!%p8_p2) target bundleno = 2 (0x2), region = 136 }

</bundles_post_ra>
